<compile_context>
chip_gen: v6e
topology: v6e:2x2x1
jax: 0.10.0
libtpu: 0.0.40
codegen_flags: <defaults>
</compile_context>

<pallas_src>
import functools
import math

import jax
import jax.numpy as jnp
from jax.experimental import pallas as pl
from jax.experimental.pallas import tpu as pltpu


def time_embedding_kernel(t_ref, w1p_ref, b1_ref, w2_ref, b2_ref, o_ref):
    # t_ref:   (B, 1)        int32   timestep indices (rows beyond the real batch are 0)
    # w1p_ref: (T_pad, D)    bf16    folded weight: table_f32 @ w1^T, zero-padded
    # b1_ref:  (1, D)        f32
    # w2_ref:  (D, D)        bf16
    # b2_ref:  (1, D)        f32
    # o_ref:   (B, D)        f32
    B = t_ref.shape[0]
    T_pad = w1p_ref.shape[0]

    # ---- embedding lookup + first Linear fused: one-hot (B,T_pad) @ W1' on the MXU ----
    row_ids = jax.lax.broadcasted_iota(jnp.int32, (B, T_pad), 1)        # (B, T_pad)
    one_hot = (row_ids == t_ref[...]).astype(jnp.bfloat16)              # lane-dense bf16
    h = jnp.dot(one_hot, w1p_ref[...],
                preferred_element_type=jnp.float32) + b1_ref[...]       # (B, D) f32

    # ---- Swish (f32 on EUP) -> second Linear (bf16 MXU inputs, f32 accumulation) ------
    h = h * jax.nn.sigmoid(h)
    o = jnp.dot(h.astype(jnp.bfloat16), w2_ref[...],
                preferred_element_type=jnp.float32) + b2_ref[...]       # (B, D) f32
    o_ref[...] = o


def make_sinusoidal_table(T, d_model):
    assert d_model % 2 == 0
    emb = jnp.arange(0, d_model, 2, dtype=jnp.float32) / d_model * math.log(10000.0)
    emb = jnp.exp(-emb)                                       # (d_model//2,)
    pos = jnp.arange(T, dtype=jnp.float32)                    # (T,)
    emb = pos[:, None] * emb[None, :]                         # (T, d_model//2)
    emb = jnp.stack([jnp.sin(emb), jnp.cos(emb)], axis=-1)    # (T, d_model//2, 2)
    return emb.reshape(T, d_model)                            # interleaved sin/cos


def xavier_uniform(key, out_features, in_features):
    # matches torch.nn.init.xavier_uniform_ on a (out, in) weight
    bound = math.sqrt(6.0 / (in_features + out_features))
    return jax.random.uniform(
        key, (out_features, in_features), jnp.float32, minval=-bound, maxval=bound
    )


@functools.partial(jax.jit, static_argnums=(5,))
def _time_embedding_forward(t, w1p, b1, w2, b2, dim):
    # t padding, the kernel call, and the output slice all in ONE jit (dispatch-bound op).
    B = t.shape[0]
    B_pad = ((B + 7) // 8) * 8                                # sublane multiple
    T_pad, dim_pad = w1p.shape
    t_pad = jnp.zeros((B_pad, 1), jnp.int32).at[:B, 0].set(t.astype(jnp.int32))

    cost = pl.CostEstimate(
        flops=2 * B_pad * (T_pad * dim_pad + dim_pad * dim_pad),
        transcendentals=B_pad * dim_pad,                      # sigmoid
        bytes_accessed=(t_pad.size * 4 + w1p.size * 2 + b1.size * 4
                        + w2.size * 2 + b2.size * 4 + B_pad * dim_pad * 4),
    )
    out = pl.pallas_call(
        time_embedding_kernel,
        out_shape=jax.ShapeDtypeStruct((B_pad, dim_pad), jnp.float32),
        in_specs=[pl.BlockSpec(memory_space=pltpu.MemorySpace.VMEM)] * 5,
        out_specs=pl.BlockSpec(memory_space=pltpu.MemorySpace.VMEM),
        cost_estimate=cost,
    )(t_pad, w1p, b1, w2, b2)
    return out[:B, :dim]


class TimeEmbeddingPallas:
    def __init__(self, T, d_model, dim, key):
        assert d_model % 2 == 0
        self.T, self.d_model, self.dim = T, d_model, dim
        self.dim_pad = ((dim + 127) // 128) * 128             # lane-dense output axis
        self.T_pad = ((T + 127) // 128) * 128                 # lane-dense one-hot axis

        self.table_f32 = make_sinusoidal_table(T, d_model)    # frozen buffer (T, d_model)

        k1, k2 = jax.random.split(key)
        # PyTorch Linear stores (out, in); forward is x @ W.T + b
        self.w1_torch = xavier_uniform(k1, dim, d_model)      # (dim, d_model)
        self.w2_torch = xavier_uniform(k2, dim, dim)          # (dim, dim)

        # Fold the frozen sinusoidal table into the first Linear (f32), then pad + cast bf16.
        w1_fold = self.table_f32 @ self.w1_torch.T            # (T, dim) f32
        w1p = jnp.zeros((self.T_pad, self.dim_pad), jnp.float32).at[:T, :dim].set(w1_fold)
        self.w1p = w1p.astype(jnp.bfloat16)                   # (T_pad, dim_pad) bf16
        w2p = jnp.zeros((self.dim_pad, self.dim_pad), jnp.float32).at[:dim, :dim].set(
            self.w2_torch.T)
        self.w2 = w2p.astype(jnp.bfloat16)                    # (dim_pad, dim_pad) bf16
        # torch init.zeros_ zeroes both Linear biases; padded tail must stay exactly zero
        # if nonzero pretrained biases are ever loaded.
        self.b1 = jnp.zeros((1, self.dim_pad), jnp.float32)
        self.b2 = jnp.zeros((1, self.dim_pad), jnp.float32)

    def __call__(self, t):
        return _time_embedding_forward(t, self.w1p, self.b1, self.w2, self.b2, self.dim)


def reference_bf16(model, t):
    # Mirrors the kernel's quantization points exactly (folded W1' in bf16, h recast bf16).
    w1_fold_q = (model.table_f32 @ model.w1_torch.T).astype(jnp.bfloat16).astype(jnp.float32)
    h = jnp.take(w1_fold_q, t, axis=0)                        # bias is zero
    h = h * jax.nn.sigmoid(h)                                 # Swish
    o = jnp.dot(h.astype(jnp.bfloat16),
                model.w2_torch.T.astype(jnp.bfloat16),
                preferred_element_type=jnp.float32)           # bias is zero
    return o


def reference_f32(model, t):
    # Pure f32 PyTorch-semantics reference (loose tolerance: bf16 MXU inputs in kernel).
    x = jnp.take(model.table_f32, t, axis=0)
    h = x @ model.w1_torch.T
    h = h * jax.nn.sigmoid(h)
    return h @ model.w2_torch.T


if __name__ == "__main__":
    key = jax.random.PRNGKey(0)
    k_param, k_t = jax.random.split(key)

    T, d_model, dim, batch = 16, 32, 64, 8
    model = TimeEmbeddingPallas(T, d_model, dim, k_param)

    t = jax.random.randint(k_t, (batch,), 0, T, dtype=jnp.int32)

    out = jax.block_until_ready(model(t))
    ref_q = reference_bf16(model, t)
    ref_f = reference_f32(model, t)

    assert out.shape == (batch, dim)
    assert jnp.allclose(out, ref_q, atol=1e-3, rtol=1e-3), float(jnp.max(jnp.abs(out - ref_q)))
    assert jnp.allclose(out, ref_f, atol=5e-2, rtol=5e-2), float(jnp.max(jnp.abs(out - ref_f)))

    print("KERNEL_OK")
</pallas_src>

<mosaic_0001>
module attributes {stable_mosaic.version = 11 : i64} {
  func.func @time_embedding_kernel(%arg0: memref<8x1xi32, #tpu.memory_space<vmem>>, %arg1: memref<128x128xbf16, #tpu.memory_space<vmem>>, %arg2: memref<1x128xf32, #tpu.memory_space<vmem>>, %arg3: memref<128x128xbf16, #tpu.memory_space<vmem>>, %arg4: memref<1x128xf32, #tpu.memory_space<vmem>>, %arg5: memref<8x128xf32, #tpu.memory_space<vmem>>) attributes {dimension_semantics = [], scalar_prefetch = 0 : i64, scratch_operands = 0 : i64, tpu.core_type = #tpu.core_type<tc>} {
    %0 = tpu.iota {dimensions = array<i32: 1>} : vector<8x128xi32>
    %c0 = arith.constant 0 : index
    %c0_0 = arith.constant 0 : index
    %1 = vector.load %arg0[%c0, %c0_0] : memref<8x1xi32, #tpu.memory_space<vmem>>, vector<8x1xi32>
    %2 = vector.broadcast %1 : vector<8x1xi32> to vector<8x128xi32>
    %3 = arith.cmpi eq, %0, %2 : vector<8x128xi32>
    %4 = arith.extui %3 : vector<8x128xi1> to vector<8x128xi32>
    %5 = arith.sitofp %4 : vector<8x128xi32> to vector<8x128xf32>
    %6 = arith.truncf %5 : vector<8x128xf32> to vector<8x128xbf16>
    %c0_1 = arith.constant 0 : index
    %c0_2 = arith.constant 0 : index
    %7 = vector.load %arg1[%c0_1, %c0_2] : memref<128x128xbf16, #tpu.memory_space<vmem>>, vector<128x128xbf16>
    %cst = arith.constant dense<0.000000e+00> : vector<8x128xf32>
    %8 = tpu.matmul %6, %7, %cst {dimension_numbers = #tpu.dot_dimension_numbers<[1], [0], [0], [1], [0, 0, 1, 1], [], []>} : vector<8x128xbf16>, vector<128x128xbf16>, vector<8x128xf32> -> vector<8x128xf32>
    %c0_3 = arith.constant 0 : index
    %c0_4 = arith.constant 0 : index
    %9 = vector.load %arg2[%c0_3, %c0_4] : memref<1x128xf32, #tpu.memory_space<vmem>>, vector<1x128xf32>
    %10 = vector.broadcast %9 : vector<1x128xf32> to vector<8x128xf32>
    %11 = arith.addf %8, %10 : vector<8x128xf32>
    %12 = arith.negf %11 : vector<8x128xf32>
    %13 = math.exp %12 : vector<8x128xf32>
    %cst_5 = arith.constant 1.000000e+00 : f32
    %14 = vector.broadcast %cst_5 : f32 to vector<8x128xf32>
    %15 = arith.addf %14, %13 : vector<8x128xf32>
    %16 = arith.divf %14, %15 : vector<8x128xf32>
    %17 = arith.mulf %11, %16 : vector<8x128xf32>
    %18 = arith.truncf %17 : vector<8x128xf32> to vector<8x128xbf16>
    %c0_6 = arith.constant 0 : index
    %c0_7 = arith.constant 0 : index
    %19 = vector.load %arg3[%c0_6, %c0_7] : memref<128x128xbf16, #tpu.memory_space<vmem>>, vector<128x128xbf16>
    %cst_8 = arith.constant dense<0.000000e+00> : vector<8x128xf32>
    %20 = tpu.matmul %18, %19, %cst_8 {dimension_numbers = #tpu.dot_dimension_numbers<[1], [0], [0], [1], [0, 0, 1, 1], [], []>} : vector<8x128xbf16>, vector<128x128xbf16>, vector<8x128xf32> -> vector<8x128xf32>
    %c0_9 = arith.constant 0 : index
    %c0_10 = arith.constant 0 : index
    %21 = vector.load %arg4[%c0_9, %c0_10] : memref<1x128xf32, #tpu.memory_space<vmem>>, vector<1x128xf32>
    %22 = vector.broadcast %21 : vector<1x128xf32> to vector<8x128xf32>
    %23 = arith.addf %20, %22 : vector<8x128xf32>
    %c0_11 = arith.constant 0 : index
    %c0_12 = arith.constant 0 : index
    %24 = vector.load %arg5[%c0_11, %c0_12] : memref<8x128xf32, #tpu.memory_space<vmem>>, vector<8x128xf32>
    tpu.vector_store %arg5[%c0_11, %c0_12], %23 {strides = array<i32>} : memref<8x128xf32, #tpu.memory_space<vmem>>, vector<8x128xf32>,
    return
  }
}

</mosaic_0001>

<bundles_post_ra>
// kernel: _time_embedding_forward.1
= control target key start
LH: loop header
LB: loop body
LE: loop exit
PB: predicated region body
PF: predicated region fallthrough
CT: control target
= control target key end

     0   :  { %10 = vsyncpa [#allocation3], 0  ;;  %s540_s0 = inlined_call_operand.vmem [shape: s32[8,1], index: 0, kind: input, shape index: {}]   ;;  %s541_s1 = inlined_call_operand.hbm [shape: bf16[128,128], index: 1, kind: input, shape index: {}]   ;;  %s542_s2 = inlined_call_operand.vmem [shape: f32[1,128], index: 2, kind: input, shape index: {}]   ;;  %s543_s3 = inlined_call_operand.hbm [shape: bf16[128,128], index: 3, kind: input, shape index: {}]   ;;  %s544_s4 = inlined_call_operand.vmem [shape: f32[1,128], index: 4, kind: input, shape index: {}]   ;;  %s545_s5 = inlined_call_operand.hbm [shape: f32[8,128], index: 5, kind: output, shape index: {}]  }
   0x1   :  { %11 = vsyncpa [#allocation6], 0 }
   0x2   :  { %12 = vsyncpa [#allocation4], 0  ;;  %s483_s18 = smov [#allocation2]  }
   0x3   :  { %s20_s19 = sshll.u32 %s483_s18, 4  ;;  %s21_s19 = int_to_ptr.vmem [resolvable:$true] %s20_s19 }
   0x4   :  { %s425_s20 = scalar_lea.vmem %s21_s19, 1024  ;;  %p430_p1 = scmp.lt.s32.totalorder %s21_s19, %s21_s19 }
   0x5   :  { %p426_p0 = scmp.ne.s32.totalorder %s21_s19, %s425_s20  ;;  %p431_p2 = scmp.lt.s32.totalorder %s425_s20, %s425_s20 }
   0x7   :  { %p432_p3 = por %p431_p2, %p430_p1 }
   0x9   :  { %p433_p4 = pnand %p432_p3, %p426_p0 }
   0xb   :  { %436 = shalt.err (!%p433_p4)
}
   0xc   :  { %s484_s21 = smov 64   ;;  %s485_s22 = smov 4  }
   0xd   :  { %26 = dma.hbm_to_vmem [thread:$0]  %s541_s1, 1024, %s21_s19, [#allocation3], %s484_s21, %s484_s21, %s485_s22  }
   0xe   :  { %s486_s25 = smov [#allocation5]  }
   0xf   :  { %s34_s26 = sshll.u32 %s486_s25, 4  ;;  %s35_s26 = int_to_ptr.vmem [resolvable:$true] %s34_s26 }
  0x10   :  { %s445_s27 = scalar_lea.vmem %s35_s26, 1024  ;;  %p450_p6 = scmp.lt.s32.totalorder %s35_s26, %s35_s26 }
  0x11   :  { %p446_p5 = scmp.ne.s32.totalorder %s35_s26, %s445_s27  ;;  %p451_p7 = scmp.lt.s32.totalorder %s445_s27, %s445_s27 }
  0x13   :  { %p452_p8 = por %p451_p7, %p450_p6 }
  0x15   :  { %p453_p9 = pnand %p452_p8, %p446_p5 }
  0x17   :  { %456 = shalt.err (!%p453_p9)
}
  0x18   :  { %40 = dma.hbm_to_vmem [thread:$0]  %s543_s3, 1024, %s35_s26, [#allocation6], %s484_s21, %s484_s21, %s485_s22  }
  0x19   :  { %477 = dma.done.wait [#allocation3], 1024  }
  0x1a   :  { %478 = vsyncadd [#allocation3], 4294966272 }
  0x1b   :  { %479 = dma.done.wait [#allocation6], 1024  }
  0x1c   :  { %480 = vsyncadd [#allocation6], 4294966272  ;;  %v487_v0 = vmov 0   ;;  %v488_v1 = vmov 0.0   ;;  %vm489_vm0 = vmmov 0   ;;  %v52_v2 = vld [vmem:[%s540_s0] sm:$0xff]  ;;  %v50_v11 = vlaneseq }
  0x1d   :  { %396 = vset.pattern.permute.xlu0 %v487_v0  ;;  %347 = vmatprep.subr.bf16.mxu0 %v488_v1  ;;  %v397_v3 = vld [vmem:[#allocation2 + $0x38] sm:$0xff]   ;;  %v398_v4 = vld [vmem:[#allocation2 + $0x30] sm:$0xff]   ;;  %v399_v5 = vld [vmem:[#allocation2 + $0x28] sm:$0xff]   ;;  %v490_v14 = vmov 1.0|1.0   ;;  %s491_s8 = smov [#allocation7]  }
  0x1e   :  { %367 = vmatprep.subr.bf16.mxu1 %v488_v1  ;;  %363 = vmatprep.mubr.msk.bf16.mxu0 %vm489_vm0, %v488_v1  ;;  %v400_v6 = vld [vmem:[#allocation2 + $0x20] sm:$0xff]   ;;  %v401_v7 = vld [vmem:[#allocation2 + $0x18] sm:$0xff]   ;;  %v402_v8 = vld [vmem:[#allocation2 + $0x10] sm:$0xff]   ;;  %v51_v12 = vand.u32 127, %v50_v11 }
  0x1f   :  { %383 = vmatprep.mubr.msk.bf16.mxu1 %vm489_vm0, %v488_v1  ;;  %54 = vperm.xlu0 %396, %v52_v2   ;;  %v403_v9 = vld [vmem:[#allocation2 + $0x8] sm:$0xff]   ;;  %v404_v10 = vld [vmem:[#allocation2] sm:$0xff]   ;;  %v405_v15 = vld [vmem:[#allocation5 + $0x38] sm:$0xff]  }
  0x20   :  { %348 = vmatpush3.bf16.msra.mxu0 %v397_v3  ;;  %368 = vmatpush3.bf16.msra.mxu1 %v405_v15  ;;  %v406_v16 = vld [vmem:[#allocation5 + $0x30] sm:$0xff]   ;;  %v407_v17 = vld [vmem:[#allocation5 + $0x28] sm:$0xff]   ;;  %v408_v18 = vld [vmem:[#allocation5 + $0x20] sm:$0xff]  }
  0x21   :  { %349 = vmatprep.subr.bf16.mxu0 %v488_v1  ;;  %369 = vmatprep.subr.bf16.mxu1 %v488_v1  ;;  %v409_v19 = vld [vmem:[#allocation5 + $0x18] sm:$0xff]   ;;  %v410_v20 = vld [vmem:[#allocation5 + $0x10] sm:$0xff]   ;;  %v411_v21 = vld [vmem:[#allocation5 + $0x8] sm:$0xff]  }
  0x22   :  { %v412_v22 = vld [vmem:[#allocation5] sm:$0xff]  }
  0x23   :  { %v308_v23 = vld [vmem:[%s542_s2] ss:$0 sm:$0xff]  ;;  %s297_s2 = sshll.u32 %s491_s8, 4  ;;  %s298_s2 = int_to_ptr.vmem [resolvable:$true] %s297_s2 }
  0x24   :  { %350 = vmatpush3.bf16.msra.mxu0 %v398_v4  ;;  %370 = vmatpush3.bf16.msra.mxu1 %v406_v16  ;;  %v320_v35 = vld [vmem:[%s544_s4] ss:$0 sm:$0xff]  ;;  %s457_s9 = scalar_lea.vmem %s298_s2, 128  ;;  %p462_p11 = scmp.lt.s32.totalorder %s298_s2, %s298_s2 }
  0x25   :  { %351 = vmatprep.subr.bf16.mxu0 %v488_v1  ;;  %371 = vmatprep.subr.bf16.mxu1 %v488_v1  ;;  %p458_p10 = scmp.ne.s32.totalorder %s298_s2, %s457_s9  ;;  %p463_p12 = scmp.lt.s32.totalorder %s457_s9, %s457_s9 }
  0x27   :  { %p464_p13 = por %p463_p12, %p462_p11 }
  0x28   :  { %352 = vmatpush3.bf16.msra.mxu0 %v399_v5  ;;  %372 = vmatpush3.bf16.msra.mxu1 %v407_v17 }
  0x29   :  { %353 = vmatprep.subr.bf16.mxu0 %v488_v1  ;;  %373 = vmatprep.subr.bf16.mxu1 %v488_v1  ;;  %p465_p0 = pnand %p464_p13, %p458_p10 }
  0x2c   :  { %354 = vmatpush3.bf16.msra.mxu0 %v400_v6  ;;  %374 = vmatpush3.bf16.msra.mxu1 %v408_v18 }
  0x2d   :  { %355 = vmatprep.subr.bf16.mxu0 %v488_v1  ;;  %375 = vmatprep.subr.bf16.mxu1 %v488_v1 }
  0x30   :  { %356 = vmatpush3.bf16.msra.mxu0 %v401_v7  ;;  %376 = vmatpush3.bf16.msra.mxu1 %v409_v19 }
  0x31   :  { %357 = vmatprep.subr.bf16.mxu0 %v488_v1  ;;  %377 = vmatprep.subr.bf16.mxu1 %v488_v1 }
  0x34   :  { %358 = vmatpush3.bf16.msra.mxu0 %v402_v8  ;;  %378 = vmatpush3.bf16.msra.mxu1 %v410_v20 }
  0x35   :  { %359 = vmatprep.subr.bf16.mxu0 %v488_v1  ;;  %379 = vmatprep.subr.bf16.mxu1 %v488_v1 }
  0x38   :  { %360 = vmatpush3.bf16.msra.mxu0 %v403_v9  ;;  %380 = vmatpush3.bf16.msra.mxu1 %v411_v21 }
  0x39   :  { %361 = vmatprep.subr.bf16.mxu0 %v488_v1  ;;  %381 = vmatprep.subr.bf16.mxu1 %v488_v1 }
  0x3c   :  { %362 = vmatpush3.bf16.msra.mxu0 %v404_v10  ;;  %382 = vmatpush3.bf16.msra.mxu1 %v412_v22 }
  0x9a   :  { %v55_v13 = vpop.permute.xlu0 %54 }
  0x9b   :  { %vm56_vm1 = vcmp.eq.s32.totalorder %v51_v12, %v55_v13 }
  0x9c   :  { %vm317_vm2 = vmpackc.low %vm56_vm1, %vm56_vm1 }
  0x9d   :  { %364 = vmatmul.mubr.msk.bf16.vlgmr.msra.gmra.mxu0 %vm317_vm2, %v490_v14 }
 0x15d   :  { %v165_v24 = vpop.f32.mrf.mxu0 }
 0x15e   :  { %v166_v25 = vadd.f32 %v308_v23, %v165_v24 }
 0x15f   :  { %v365_v26 = vpop.f32.mrf.mxu0 }
 0x160   :  { %v319_v27 = vmul.f32 -1.442695, %v166_v25 }
 0x161   :  { %v168_v28 = vpop.f32.mrf.mxu0 }
 0x162   :  { %413 = vpow2.f32 %v319_v27 }
 0x163   :  { %v366_v29 = vpop.f32.mrf.mxu0 }
 0x16f   :  { %v414_v30 = vpop.eup %413 }
 0x170   :  { %v174_v31 = vadd.f32 1.0, %v414_v30 }
 0x172   :  { %415 = vrcp.f32 %v174_v31 }
 0x17f   :  { %v416_v32 = vpop.eup %415 }
 0x180   :  { %v177_v33 = vmul.f32 %v416_v32, %v166_v25 }
 0x182   :  { %v178_v34 = vpack.c.bf16 %v177_v33, %v177_v33 }
 0x184   :  { %384 = vmatmul.mubr.bf16.vlgmr.msra.gmra.mxu1 %v178_v34 }
 0x244   :  { %v284_v36 = vpop.f32.mrf.mxu1 }
 0x245   :  { %v285_v37 = vadd.f32 %v320_v35, %v284_v36 }
 0x246   :  { %v385_v38 = vpop.f32.mrf.mxu1 }
 0x247   :  { %290 = vst [vmem:[#allocation7] sm:$0xff] %v285_v37 }
 0x248   :  { %v287_v39 = vpop.f32.mrf.mxu1 }
 0x249   :  { %468 = shalt.err (!%p465_p0)
}
 0x24a   :  { %300 = dma.vmem_to_hbm [thread:$0]  %s298_s2, 128, %s545_s5, [#allocation4]   ;;  %v386_v40 = vpop.f32.mrf.mxu1 }
 0x24b   :  { %481 = dma.done.wait [#allocation4], 128  }
 0x24c   :  { %482 = vsyncadd [#allocation4], 4294967168 }
 0x24d   :  { %304 = vsyncpa [#allocation3], 1 }
 0x24e   :  { %305 = vsyncpa [#allocation6], 1 }
 0x24f   :  { %306 = vsyncpa [#allocation4], 1 }

</bundles_post_ra>
